<compile_context>
chip_gen: v7x
topology: tpu7x:2x2x1
jax: 0.10.0
libtpu: 0.0.40
codegen_flags: <defaults>
</compile_context>

<pallas_src>
import jax
import jax.numpy as jnp
from jax import lax
from jax.experimental import pallas as pl
from jax.experimental.pallas import tpu as pltpu

EPS = 1e-5  # NodeLevelBatchNorm eps


def _bn_relu(h, gamma, beta):
    """Node-level BatchNorm (batch stats, biased var), folded affine + ReLU.

    Single-pass statistics: var = E[h^2] - mean^2 (halves the cross-sublane
    reductions and removes the extra (h-mean)^2 VPU pass).
    """
    mean = jnp.mean(h, axis=0, keepdims=True)            # [1, C]
    meansq = jnp.mean(h * h, axis=0, keepdims=True)       # [1, C]
    var = meansq - mean * mean
    scale = gamma * lax.rsqrt(var + EPS)                   # [1, C]
    shift = beta - mean * scale                            # [1, C]
    return jnp.maximum(h * scale + shift, 0.0)


def res_layer_fused_kernel(x_ref, a_ref, wr1_ref, wx1_ref, g1_ref, b1_ref,
                           w2_ref, g2_ref, b2_ref, o_ref):
    """Fused ResLayer forward.

    x:   [N, Cin]       f32 node features
    a:   [N, N]         bf16 dense adjacency, A[i, j] = #edges j->i
    wr1: [Cin, C1]      bf16 W_rel of conv1
    wx1: [Cin, C1]      bf16 W_root of conv1
    w2:  [2*C1, C2]     bf16 stacked [W_rel2; W_root2]
    g*, b*: [1, C*]     f32 BN affine params
    o:   [N, Cin + C2]  f32 = concat([x, h2], axis=1)
    """
    cin = x_ref.shape[1]
    x = x_ref[...]                                   # f32 [N, Cin]
    a = a_ref[...]                                   # bf16 [N, N]
    xb = x.astype(jnp.bfloat16)

    # ---- layer 1: GraphConv (two dots, no sub-lane concat) + BN + ReLU ----
    aggr1 = jnp.dot(a, xb, preferred_element_type=jnp.float32)              # [N, Cin]
    h1 = (jnp.dot(aggr1.astype(jnp.bfloat16), wr1_ref[...],
                  preferred_element_type=jnp.float32)
          + jnp.dot(xb, wx1_ref[...], preferred_element_type=jnp.float32))  # [N, C1]
    h1 = _bn_relu(h1, g1_ref[...], b1_ref[...])

    # ---- layer 2: GraphConv (merged matmul, K = 2*C1 = 256, lane-aligned
    #      128+128 concat) + BN + ReLU ----
    h1b = h1.astype(jnp.bfloat16)
    aggr2 = jnp.dot(a, h1b, preferred_element_type=jnp.float32)             # [N, C1]
    z2 = jnp.concatenate([aggr2, h1], axis=1).astype(jnp.bfloat16)          # [N, 2*C1]
    h2 = jnp.dot(z2, w2_ref[...], preferred_element_type=jnp.float32)       # [N, C2]
    h2 = _bn_relu(h2, g2_ref[...], b2_ref[...])

    # ---- residual concat: direct slab stores, no concatenate relayout ----
    # TODO(synk): in a chained dense block, pad/align the h2 slab to a
    # 128-lane boundary and write it in place of a donated buffer
    # (input_output_aliases) to get fully unmasked stores.
    o_ref[:, :cin] = x
    o_ref[:, cin:] = h2


def build_adjacency(edge_index, num_nodes):
    """Dense adjacency A[i, j] = #edges j -> i, built ONCE per graph.

    bf16 is exact for edge multiplicities < 256 and halves HBM/VMEM traffic.
    Reuse the returned array for every ResLayer of a dense block.
    """
    src, dst = edge_index[0], edge_index[1]
    a = jnp.zeros((num_nodes, num_nodes), jnp.float32).at[dst, src].add(1.0)
    # bf16 exactness guard (cheap at graph-construction time, once per graph).
    assert float(jnp.max(a)) < 256.0, "edge multiplicity too large for bf16 adjacency"
    return a.astype(jnp.bfloat16)


def _vmem_limit_bytes(n, cin, c1, c2):
    """Scoped-VMEM budget from the real footprint, with headroom, <= 48 MiB."""
    a_b = 2 * n * n                                       # bf16 adjacency
    x_b = 4 * n * cin                                     # f32 x
    act_b = 4 * n * (cin + 4 * c1 + 2 * c2)               # aggr1/h1/aggr2/z2/h2 (f32-ish)
    w_b = 2 * (2 * cin * c1 + 2 * c1 * c2)                # bf16 weights
    bn_b = 4 * 2 * (c1 + c2)                              # f32 gammas/betas
    out_b = 4 * n * (cin + c2)                            # f32 output
    need = a_b + x_b + act_b + w_b + bn_b + out_b
    # 2x headroom for compiler temporaries; never ask for v7x's full 64 MiB.
    return int(min(max(2 * need, 8 << 20), 48 << 20))


def res_layer_forward(x, a, params):
    """ResLayer.forward: one fused pallas_call (GraphConvBn x2 + concat).

    `a` is the dense adjacency from build_adjacency (built once per graph).
    """
    n, cin = x.shape
    c1 = params["w_rel1"].shape[1]
    c2 = params["w2"].shape[1]

    flops = 2 * n * n * (cin + c1) + 4 * n * cin * c1 + 4 * n * c1 * c2
    bytes_accessed = (4 * n * cin + 2 * n * n
                      + 2 * (2 * cin * c1 + 2 * c1 * c2)
                      + 4 * 2 * (c1 + c2)
                      + 4 * n * (cin + c2))
    cost = pl.CostEstimate(flops=flops, transcendentals=c1 + c2,
                           bytes_accessed=bytes_accessed)

    return pl.pallas_call(
        res_layer_fused_kernel,
        out_shape=jax.ShapeDtypeStruct((n, cin + c2), jnp.float32),
        in_specs=[pl.BlockSpec(memory_space=pltpu.MemorySpace.VMEM)] * 9,
        out_specs=pl.BlockSpec(memory_space=pltpu.MemorySpace.VMEM),
        compiler_params=pltpu.CompilerParams(
            vmem_limit_bytes=_vmem_limit_bytes(n, cin, c1, c2)),
        cost_estimate=cost,
    )(x, a,
      params["w_rel1"], params["w_root1"], params["gamma1"], params["beta1"],
      params["w2"], params["gamma2"], params["beta2"])


def init_params(key, in_ch, growth_rate=32, bn_size=4):
    c1 = int(growth_rate * bn_size)   # conv1 output channels (128)
    c2 = growth_rate                  # conv2 output channels (32)
    ks = jax.random.split(key, 4)

    def glorot(k, fan_in, fan_out):
        s = (6.0 / (fan_in + fan_out)) ** 0.5
        return jax.random.uniform(k, (fan_in, fan_out), jnp.float32, -s, s)

    # conv1 weights kept separate (layer-1 uses two dots); conv2 weights
    # pre-stacked as [W_rel2; W_root2] for the single merged K=256 matmul.
    w_rel1 = glorot(ks[0], in_ch, c1)
    w_root1 = glorot(ks[1], in_ch, c1)
    w2 = jnp.concatenate([glorot(ks[2], c1, c2), glorot(ks[3], c1, c2)], axis=0)

    return dict(
        w_rel1=w_rel1.astype(jnp.bfloat16),
        w_root1=w_root1.astype(jnp.bfloat16),
        gamma1=jnp.ones((1, c1), jnp.float32),
        beta1=jnp.zeros((1, c1), jnp.float32),
        w2=w2.astype(jnp.bfloat16),
        gamma2=jnp.ones((1, c2), jnp.float32),
        beta2=jnp.zeros((1, c2), jnp.float32),
    )
    # TODO(synk): conv3 (Conv1dReLU 1x1) only exists when use_1x1conv=True; the
    # default constructor (as used here) sets it to None, so it is omitted.


def _reference(x, a, params):
    """Pure-JAX f32 reference of the same forward (same bf16 weight values)."""
    af = a.astype(jnp.float32)
    wr1 = params["w_rel1"].astype(jnp.float32)
    wx1 = params["w_root1"].astype(jnp.float32)
    w2 = params["w2"].astype(jnp.float32)

    def bn_relu(h, g, b):
        mean = jnp.mean(h, axis=0, keepdims=True)
        var = jnp.mean((h - mean) ** 2, axis=0, keepdims=True)
        return jnp.maximum((h - mean) * (g * lax.rsqrt(var + EPS)) + b, 0.0)

    h1 = bn_relu(af @ x @ wr1 + x @ wx1, params["gamma1"], params["beta1"])
    h2 = bn_relu(jnp.concatenate([af @ h1, h1], axis=1) @ w2,
                 params["gamma2"], params["beta2"])
    return jnp.concatenate([x, h2], axis=1)


if __name__ == "__main__":
    key = jax.random.PRNGKey(0)
    k_x, k_e, k_p = jax.random.split(key, 3)

    n_nodes = 16          # "batch of graph nodes"
    in_channels = 8
    growth_rate = 32
    bn_size = 4
    n_edges = 32

    x = jax.random.normal(k_x, (n_nodes, in_channels), jnp.float32)
    edge_index = jax.random.randint(k_e, (2, n_edges), 0, n_nodes, jnp.int32)
    params = init_params(k_p, in_channels, growth_rate, bn_size)

    # Adjacency built once per graph (reused across all layers of a dense block).
    a = build_adjacency(edge_index, n_nodes)

    out = res_layer_forward(x, a, params)
    out = jax.block_until_ready(out)

    assert out.shape == (n_nodes, in_channels + growth_rate), out.shape

    # bf16-MXU kernel vs f32 reference: assert documented tolerance.
    ref = _reference(x, a, params)
    max_err = float(jnp.max(jnp.abs(out - ref)))
    assert max_err < 5e-2, f"max abs error vs f32 reference: {max_err}"

    print("KERNEL_OK")
</pallas_src>

<mosaic_0001>
module attributes {stable_mosaic.version = 11 : i64} {
  func.func @res_layer_fused_kernel(%arg0: memref<16x8xf32, #tpu.memory_space<vmem>>, %arg1: memref<16x16xbf16, #tpu.memory_space<vmem>>, %arg2: memref<8x128xbf16, #tpu.memory_space<vmem>>, %arg3: memref<8x128xbf16, #tpu.memory_space<vmem>>, %arg4: memref<1x128xf32, #tpu.memory_space<vmem>>, %arg5: memref<1x128xf32, #tpu.memory_space<vmem>>, %arg6: memref<256x32xbf16, #tpu.memory_space<vmem>>, %arg7: memref<1x32xf32, #tpu.memory_space<vmem>>, %arg8: memref<1x32xf32, #tpu.memory_space<vmem>>, %arg9: memref<16x40xf32, #tpu.memory_space<vmem>>) attributes {dimension_semantics = [], scalar_prefetch = 0 : i64, scratch_operands = 0 : i64, tpu.core_type = #tpu.core_type<tc>} {
    %c0 = arith.constant 0 : index
    %c0_0 = arith.constant 0 : index
    %0 = vector.load %arg0[%c0, %c0_0] : memref<16x8xf32, #tpu.memory_space<vmem>>, vector<16x8xf32>
    %c0_1 = arith.constant 0 : index
    %c0_2 = arith.constant 0 : index
    %1 = vector.load %arg1[%c0_1, %c0_2] : memref<16x16xbf16, #tpu.memory_space<vmem>>, vector<16x16xbf16>
    %2 = arith.truncf %0 : vector<16x8xf32> to vector<16x8xbf16>
    %cst = arith.constant dense<0.000000e+00> : vector<16x8xf32>
    %3 = tpu.matmul %1, %2, %cst {dimension_numbers = #tpu.dot_dimension_numbers<[1], [0], [0], [1], [0, 0, 1, 1], [], []>} : vector<16x16xbf16>, vector<16x8xbf16>, vector<16x8xf32> -> vector<16x8xf32>
    %4 = arith.truncf %3 : vector<16x8xf32> to vector<16x8xbf16>
    %c0_3 = arith.constant 0 : index
    %c0_4 = arith.constant 0 : index
    %5 = vector.load %arg2[%c0_3, %c0_4] : memref<8x128xbf16, #tpu.memory_space<vmem>>, vector<8x128xbf16>
    %cst_5 = arith.constant dense<0.000000e+00> : vector<16x128xf32>
    %6 = tpu.matmul %4, %5, %cst_5 {dimension_numbers = #tpu.dot_dimension_numbers<[1], [0], [0], [1], [0, 0, 1, 1], [], []>} : vector<16x8xbf16>, vector<8x128xbf16>, vector<16x128xf32> -> vector<16x128xf32>
    %c0_6 = arith.constant 0 : index
    %c0_7 = arith.constant 0 : index
    %7 = vector.load %arg3[%c0_6, %c0_7] : memref<8x128xbf16, #tpu.memory_space<vmem>>, vector<8x128xbf16>
    %cst_8 = arith.constant dense<0.000000e+00> : vector<16x128xf32>
    %8 = tpu.matmul %2, %7, %cst_8 {dimension_numbers = #tpu.dot_dimension_numbers<[1], [0], [0], [1], [0, 0, 1, 1], [], []>} : vector<16x8xbf16>, vector<8x128xbf16>, vector<16x128xf32> -> vector<16x128xf32>
    %9 = arith.addf %6, %8 : vector<16x128xf32>
    %c0_9 = arith.constant 0 : index
    %c0_10 = arith.constant 0 : index
    %10 = vector.load %arg4[%c0_9, %c0_10] : memref<1x128xf32, #tpu.memory_space<vmem>>, vector<1x128xf32>
    %c0_11 = arith.constant 0 : index
    %c0_12 = arith.constant 0 : index
    %11 = vector.load %arg5[%c0_11, %c0_12] : memref<1x128xf32, #tpu.memory_space<vmem>>, vector<1x128xf32>
    %cst_13 = arith.constant dense<0.000000e+00> : vector<128xf32>
    %12 = vector.multi_reduction <add>, %9, %cst_13 [0] : vector<16x128xf32> to vector<128xf32>
    %13 = vector.shape_cast %12 : vector<128xf32> to vector<1x128xf32>
    %cst_14 = arith.constant 1.600000e+01 : f32
    %14 = vector.broadcast %cst_14 : f32 to vector<1x128xf32>
    %15 = arith.divf %13, %14 : vector<1x128xf32>
    %16 = arith.mulf %9, %9 : vector<16x128xf32>
    %cst_15 = arith.constant dense<0.000000e+00> : vector<128xf32>
    %17 = vector.multi_reduction <add>, %16, %cst_15 [0] : vector<16x128xf32> to vector<128xf32>
    %18 = vector.shape_cast %17 : vector<128xf32> to vector<1x128xf32>
    %cst_16 = arith.constant 1.600000e+01 : f32
    %19 = vector.broadcast %cst_16 : f32 to vector<1x128xf32>
    %20 = arith.divf %18, %19 : vector<1x128xf32>
    %21 = arith.mulf %15, %15 : vector<1x128xf32>
    %22 = arith.subf %20, %21 : vector<1x128xf32>
    %cst_17 = arith.constant 9.99999974E-6 : f32
    %23 = vector.broadcast %cst_17 : f32 to vector<1x128xf32>
    %24 = arith.addf %22, %23 : vector<1x128xf32>
    %25 = math.rsqrt %24 : vector<1x128xf32>
    %26 = arith.mulf %10, %25 : vector<1x128xf32>
    %27 = arith.mulf %15, %26 : vector<1x128xf32>
    %28 = arith.subf %11, %27 : vector<1x128xf32>
    %29 = vector.broadcast %26 : vector<1x128xf32> to vector<16x128xf32>
    %30 = arith.mulf %9, %29 : vector<16x128xf32>
    %31 = vector.broadcast %28 : vector<1x128xf32> to vector<16x128xf32>
    %32 = arith.addf %30, %31 : vector<16x128xf32>
    %cst_18 = arith.constant 0.000000e+00 : f32
    %33 = vector.broadcast %cst_18 : f32 to vector<16x128xf32>
    %34 = arith.maximumf %32, %33 : vector<16x128xf32>
    %35 = arith.truncf %34 : vector<16x128xf32> to vector<16x128xbf16>
    %cst_19 = arith.constant dense<0.000000e+00> : vector<16x128xf32>
    %36 = tpu.matmul %1, %35, %cst_19 {dimension_numbers = #tpu.dot_dimension_numbers<[1], [0], [0], [1], [0, 0, 1, 1], [], []>} : vector<16x16xbf16>, vector<16x128xbf16>, vector<16x128xf32> -> vector<16x128xf32>
    %37 = tpu.concatenate %36, %34 in 1 : vector<16x128xf32>, vector<16x128xf32> -> vector<16x256xf32>
    %38 = arith.truncf %37 : vector<16x256xf32> to vector<16x256xbf16>
    %c0_20 = arith.constant 0 : index
    %c0_21 = arith.constant 0 : index
    %39 = vector.load %arg6[%c0_20, %c0_21] : memref<256x32xbf16, #tpu.memory_space<vmem>>, vector<256x32xbf16>
    %cst_22 = arith.constant dense<0.000000e+00> : vector<16x32xf32>
    %40 = tpu.matmul %38, %39, %cst_22 {dimension_numbers = #tpu.dot_dimension_numbers<[1], [0], [0], [1], [0, 0, 1, 1], [], []>} : vector<16x256xbf16>, vector<256x32xbf16>, vector<16x32xf32> -> vector<16x32xf32>
    %c0_23 = arith.constant 0 : index
    %c0_24 = arith.constant 0 : index
    %41 = vector.load %arg7[%c0_23, %c0_24] : memref<1x32xf32, #tpu.memory_space<vmem>>, vector<1x32xf32>
    %c0_25 = arith.constant 0 : index
    %c0_26 = arith.constant 0 : index
    %42 = vector.load %arg8[%c0_25, %c0_26] : memref<1x32xf32, #tpu.memory_space<vmem>>, vector<1x32xf32>
    %cst_27 = arith.constant dense<0.000000e+00> : vector<32xf32>
    %43 = vector.multi_reduction <add>, %40, %cst_27 [0] : vector<16x32xf32> to vector<32xf32>
    %44 = vector.shape_cast %43 : vector<32xf32> to vector<1x32xf32>
    %cst_28 = arith.constant 1.600000e+01 : f32
    %45 = vector.broadcast %cst_28 : f32 to vector<1x32xf32>
    %46 = arith.divf %44, %45 : vector<1x32xf32>
    %47 = arith.mulf %40, %40 : vector<16x32xf32>
    %cst_29 = arith.constant dense<0.000000e+00> : vector<32xf32>
    %48 = vector.multi_reduction <add>, %47, %cst_29 [0] : vector<16x32xf32> to vector<32xf32>
    %49 = vector.shape_cast %48 : vector<32xf32> to vector<1x32xf32>
    %cst_30 = arith.constant 1.600000e+01 : f32
    %50 = vector.broadcast %cst_30 : f32 to vector<1x32xf32>
    %51 = arith.divf %49, %50 : vector<1x32xf32>
    %52 = arith.mulf %46, %46 : vector<1x32xf32>
    %53 = arith.subf %51, %52 : vector<1x32xf32>
    %cst_31 = arith.constant 9.99999974E-6 : f32
    %54 = vector.broadcast %cst_31 : f32 to vector<1x32xf32>
    %55 = arith.addf %53, %54 : vector<1x32xf32>
    %56 = math.rsqrt %55 : vector<1x32xf32>
    %57 = arith.mulf %41, %56 : vector<1x32xf32>
    %58 = arith.mulf %46, %57 : vector<1x32xf32>
    %59 = arith.subf %42, %58 : vector<1x32xf32>
    %60 = vector.broadcast %57 : vector<1x32xf32> to vector<16x32xf32>
    %61 = arith.mulf %40, %60 : vector<16x32xf32>
    %62 = vector.broadcast %59 : vector<1x32xf32> to vector<16x32xf32>
    %63 = arith.addf %61, %62 : vector<16x32xf32>
    %cst_32 = arith.constant 0.000000e+00 : f32
    %64 = vector.broadcast %cst_32 : f32 to vector<16x32xf32>
    %65 = arith.maximumf %63, %64 : vector<16x32xf32>
    %c0_33 = arith.constant 0 : index
    %c0_34 = arith.constant 0 : index
    %66 = vector.load %arg9[%c0_33, %c0_34] : memref<16x40xf32, #tpu.memory_space<vmem>>, vector<16x8xf32>
    tpu.vector_store %arg9[%c0_33, %c0_34], %0 {strides = array<i32>} : memref<16x40xf32, #tpu.memory_space<vmem>>, vector<16x8xf32>,
    %c0_35 = arith.constant 0 : index
    %c8 = arith.constant 8 : index
    %67 = vector.load %arg9[%c0_35, %c8] : memref<16x40xf32, #tpu.memory_space<vmem>>, vector<16x32xf32>
    tpu.vector_store %arg9[%c0_35, %c8], %65 {strides = array<i32>} : memref<16x40xf32, #tpu.memory_space<vmem>>, vector<16x32xf32>,
    return
  }
}

</mosaic_0001>

<bundles_post_ra>
// kernel: tpu_custom_call.1
= control target key start
LH: loop header
LB: loop body
LE: loop exit
PB: predicated region body
PF: predicated region fallthrough
CT: control target
= control target key end

     0   :  { %vm92_vm0 = vcmask 64512   ;;  %v654_v3 = vmov 0.0   ;;  %vm655_vm1 = vmmov 0   ;;  %vm44_vm2 = vcmask 130048   ;;  %s816_s0 = inlined_call_operand.vmem [shape: f32[16,8], index: 0, kind: input, shape index: {}]   ;;  %s817_s1 = inlined_call_operand.vmem [shape: bf16[16,16], index: 1, kind: input, shape index: {}]   ;;  %s818_s2 = inlined_call_operand.vmem [shape: bf16[8,128], index: 2, kind: input, shape index: {}]   ;;  %s819_s3 = inlined_call_operand.vmem [shape: bf16[8,128], index: 3, kind: input, shape index: {}]   ;;  %s820_s4 = inlined_call_operand.vmem [shape: f32[1,128], index: 4, kind: input, shape index: {}]   ;;  %s821_s5 = inlined_call_operand.vmem [shape: f32[1,128], index: 5, kind: input, shape index: {}]   ;;  %s822_s6 = inlined_call_operand.vmem [shape: bf16[256,32], index: 6, kind: input, shape index: {}]   ;;  %s823_s7 = inlined_call_operand.vmem [shape: f32[1,32], index: 7, kind: input, shape index: {}]   ;;  %s824_s8 = inlined_call_operand.vmem [shape: f32[1,32], index: 8, kind: input, shape index: {}]   ;;  %s825_s9 = inlined_call_operand.hbm [shape: f32[16,40], index: 9, kind: output, shape index: {}]  }
   0x1   :  { %v34_v0 = vld [vmem:[%s816_s0] sm:$0xff]  ;;  %v35_v1 = vld [vmem:[%s816_s0 + $0x8] sm:$0xff]  ;;  %576 = vmatprep.subr.bf16.mxu1 %v654_v3  ;;  %578 = vmatprep.mubr.msk.bf16.mxu1 %vm655_vm1, %v654_v3  ;;  %vm96_vm3 = vcmask 1043456  }
   0x2   :  { %v718_v2 = vld [vmem:[%s817_s1] sm:$0xff]   ;;  %v38_v4 = vpack.c.bf16 %v35_v1, %v34_v0  ;;  %496 = vst.msk [vmem:[#allocation2] sm:$0xff] %vm92_vm0, %v34_v0  ;;  %497 = vst.msk [vmem:[#allocation2 + $0x8] sm:$0xff] %vm92_vm0, %v35_v1 }
   0x3   :  { %v91_v5 = vld [vmem:[%s819_s3] sm:$0xf] }
   0x4   :  { %v90_v6 = vld [vmem:[%s818_s2] sm:$0xf]  ;;  %577 = vmatpush3.bf16.msra.mxu1 %v38_v4  ;;  %v98_v7 = vsel %vm96_vm3, %v91_v5, 0 }
   0x5   :  { %v145_v8 = vsel %vm96_vm3, %v90_v6, 0  ;;  %582 = vmatprep.subr.bf16.mxu1 %v654_v3 }
   0x7   :  { %579 = vmatmul.mubr.msk.bf16.vlgmr.msra.gmra.mrb[0].mxu1 %vm44_vm2, %v718_v2 }
   0x8   :  { %583 = vmatpush3.bf16.msra.mxu1 %v98_v7  ;;  %584 = vmatprep.mubr.msk.bf16.mxu1 %vm655_vm1, %v654_v3 }
   0x9   :  { %588 = vmatprep.subr.bf16.mxu1 %v654_v3 }
   0xa   :  { %14 = vsyncpa [#allocation3], 0  ;;  %v610_v14 = vld [vmem:[%s822_s6 + $0x40] sm:$0xff]   ;;  %v612_v16 = vld [vmem:[%s822_s6 + $0x48] sm:$0xff]   ;;  %v217_v53 = vlaneseq  ;;  %vm448_vm4 = vcmask 261120   ;;  %s656_s27 = smov 8  }
   0xb   :  { %v611_v15 = vld [vmem:[%s822_s6] sm:$0xff]   ;;  %554 = vmatprep.subr.bf16.mxu0 %v610_v14  ;;  %v613_v17 = vld [vmem:[%s822_s6 + $0x8] sm:$0xff]   ;;  %v614_v18 = vld [vmem:[%s822_s6 + $0x50] sm:$0xff]   ;;  %vm506_vm5 = vcmask 326720  }
   0xc   :  { %555 = vmatpush3.bf16.msra.mxu0 %v611_v15  ;;  %v615_v19 = vld [vmem:[%s822_s6 + $0x10] sm:$0xff]   ;;  %v616_v20 = vld [vmem:[%s822_s6 + $0x58] sm:$0xff]   ;;  %v618_v22 = vld [vmem:[%s822_s6 + $0x60] sm:$0xff]   ;;  %v218_v54 = vshrl.u32 %v217_v53, 7 }
   0xd   :  { %556 = vmatprep.subr.bf16.mxu0 %v612_v16  ;;  %v617_v21 = vld [vmem:[%s822_s6 + $0x18] sm:$0xff]   ;;  %v619_v23 = vld [vmem:[%s822_s6 + $0x20] sm:$0xff]   ;;  %v620_v24 = vld [vmem:[%s822_s6 + $0x68] sm:$0xff]  }
   0xe   :  { %v621_v25 = vld [vmem:[%s822_s6 + $0x28] sm:$0xff]   ;;  %v622_v26 = vld [vmem:[%s822_s6 + $0x70] sm:$0xff]   ;;  %v188_v55 = vld [vmem:[%s820_s4] sm:$0x1]  ;;  %v781_v56 = vsub.s32 0, %v218_v54 }
   0xf   :  { %585 = vmatmul.mubr.msk.bf16.vlgmr.msra.gmra.mrb[4].mxu1 %vm92_vm0, %v38_v4  ;;  %v623_v27 = vld [vmem:[%s822_s6 + $0x30] sm:$0xff]   ;;  %v189_v59 = vld [vmem:[%s821_s5] sm:$0x1] }
  0x10   :  { %589 = vmatpush3.bf16.msra.mxu1 %v145_v8  ;;  %590 = vmatprep.mubr.msk.bf16.mxu1 %vm655_vm1, %v654_v3  ;;  %v624_v8 = vld [vmem:[%s822_s6 + $0x78] sm:$0xff]  }
  0x11   :  { %594 = vmatprep.subr.bf16.mxu1 %v654_v3  ;;  %557 = vmatpush3.bf16.msra.mxu0 %v613_v17 }
  0x12   :  { %558 = vmatprep.subr.bf16.mxu0 %v614_v18 }
  0x15   :  { %559 = vmatpush3.bf16.msra.mxu0 %v615_v19 }
  0x16   :  { %560 = vmatprep.subr.bf16.mxu0 %v616_v20 }
  0x19   :  { %561 = vmatpush3.bf16.msra.mxu0 %v617_v21 }
  0x1a   :  { %562 = vmatprep.subr.bf16.mxu0 %v618_v22 }
  0x1d   :  { %563 = vmatpush3.bf16.msra.mxu0 %v619_v23 }
  0x1e   :  { %564 = vmatprep.subr.bf16.mxu0 %v620_v24 }
  0x21   :  { %565 = vmatpush3.bf16.msra.mxu0 %v621_v25 }
  0x22   :  { %566 = vmatprep.subr.bf16.mxu0 %v622_v26 }
  0x25   :  { %567 = vmatpush3.bf16.msra.mxu0 %v623_v27 }
  0x26   :  { %568 = vmatprep.subr.bf16.mxu0 %v624_v8 }
  0xda   :  { %v82_v9 = vpop.f32.mrb[0].mxu1 }
  0xdb   :  { %v580_v10 = vpop.f32.mrb[1].mxu1 }
  0xdc   :  { %v85_v11 = vpop.f32.mrb[2].mxu1 }
  0xdd   :  { %v89_v12 = vpack.c.bf16 %v85_v11, %v82_v9  ;;  %v581_v13 = vpop.f32.mrb[3].mxu1  ;;  %v625_v9 = vld [vmem:[%s822_s6 + $0x38] sm:$0xff]  }
  0xde   :  { %569 = vmatpush3.bf16.msra.mxu0 %v625_v9 }
  0xdf   :  { %591 = vmatmul.mubr.msk.bf16.vlgmr.msra.gmra.mrb[4].mxu1 %vm92_vm0, %v89_v12 }
  0xe0   :  { %596 = vmatprep.mubr.msk.bf16.mxu1 %vm655_vm1, %v654_v3 }
 0x1b2   :  { %v181_v28 = vpop.f32.mrb[4].mxu1 }
 0x1b3   :  { %v592_v29 = vpop.f32.mrb[5].mxu1  ;;  %v199_v31 = vmul.f32 %v181_v28, %v181_v28 }
 0x1b4   :  { %v184_v30 = vpop.f32.mrb[6].mxu1 }
 0x1b5   :  { %v190_v32 = vadd.f32 %v184_v30, %v181_v28  ;;  %v200_v33 = vmul.f32 %v184_v30, %v184_v30  ;;  %v593_v34 = vpop.f32.mrb[7].mxu1 }
 0x1b7   :  { %v191_v35 = vrot.slane %v190_v32, 4  ;;  %v201_v36 = vadd.f32 %v200_v33, %v199_v31 }
 0x1b9   :  { %v192_v37 = vadd.f32 %v191_v35, %v190_v32  ;;  %v202_v38 = vrot.slane %v201_v36, 4 }
 0x1bb   :  { %v193_v39 = vrot.slane %v192_v37, 2  ;;  %v203_v40 = vadd.f32 %v202_v38, %v201_v36 }
 0x1bd   :  { %v194_v41 = vadd.f32 %v193_v39, %v192_v37  ;;  %v204_v42 = vrot.slane %v203_v40, 2 }
 0x1bf   :  { %v195_v43 = vrot.slane %v194_v41, 1  ;;  %v205_v44 = vadd.f32 %v204_v42, %v203_v40 }
 0x1c1   :  { %v196_v45 = vadd.f32 %v195_v43, %v194_v41  ;;  %v206_v46 = vrot.slane %v205_v44, 1 }
 0x1c3   :  { %v198_v47 = vmul.f32 0.0625, %v196_v45  ;;  %v207_v48 = vadd.f32 %v206_v46, %v205_v44  ;;  %v446_v45 = vld [vmem:[%s823_s7] sm:$0x1]  ;;  %s657_s7 = smov [#allocation2]  }
 0x1c4   :  { %s514_s28 = sshll.u32 %s657_s7, 4  ;;  %s515_s28 = int_to_ptr.vmem [resolvable:$true] %s514_s28 }
 0x1c5   :  { %v208_v49 = vmul.f32 0.0625, %v207_v48  ;;  %v209_v50 = vmul.f32 %v198_v47, %v198_v47  ;;  %v447_v48 = vld [vmem:[%s824_s8] sm:$0x1]  ;;  %s630_s8 = scalar_lea.vmem %s515_s28, 256  ;;  %p635_p1 = scmp.lt.s32.totalorder %s515_s28, %s515_s28 }
 0x1c6   :  { %p631_p0 = scmp.ne.s32.totalorder %s515_s28, %s630_s8  ;;  %p636_p2 = scmp.lt.s32.totalorder %s630_s8, %s630_s8 }
 0x1c7   :  { %v210_v51 = vsub.f32 %v208_v49, %v209_v50 }
 0x1c8   :  { %p637_p3 = por %p636_p2, %p635_p1 }
 0x1c9   :  { %v211_v52 = vadd.f32 1e-05, %v210_v51 }
 0x1ca   :  { %p638_p4 = pnand %p637_p3, %p631_p0 }
 0x1cb   :  { %626 = vrsqrt.f32 %v211_v52 }
 0x1d5   :  { %v627_v57 = vpop.eup %626 }
 0x1d6   :  { %v213_v58 = vmul.f32 %v627_v57, %v188_v55 }
 0x1d8   :  { %v214_v60 = vmul.f32 %v213_v58, %v198_v47  ;;  %v220_v61 = vrot.slane %v213_v58, %v781_v56 }
 0x1da   :  { %v215_v62 = vsub.f32 %v189_v59, %v214_v60  ;;  %v222_v63 = vmul.f32 %v220_v61, %v181_v28  ;;  %v223_v0 = vmul.f32 %v220_v61, %v184_v30 }
 0x1dc   :  { %v228_v1 = vrot.slane %v215_v62, %v781_v56 }
 0x1de   :  { %v230_v3 = vadd.f32 %v228_v1, %v222_v63  ;;  %v231_v4 = vadd.f32 %v228_v1, %v223_v0 }
 0x1e0   :  { %v233_v5 = vmax.f32 %v231_v4, 0.0  ;;  %v232_v6 = vmax.f32 %v230_v3, 0.0 }
 0x1e2   :  { %v234_v7 = vpack.c.bf16 %v233_v5, %v232_v6 }
 0x1e4   :  { %595 = vmatpush3.bf16.msra.mxu1 %v234_v7  ;;  %437 = vmatprep.mubr.bf16.mxu0 %v234_v7 }
 0x1e7   :  { %597 = vmatmul.mubr.msk.bf16.vlgmr.msra.gmra.mrb[8].mxu1 %vm44_vm2, %v718_v2 }
 0x2ba   :  { %v269_v10 = vpop.f32.mrb[8].mxu1 }
 0x2bb   :  { %v598_v11 = vpop.f32.mrb[9].mxu1 }
 0x2bc   :  { %v272_v12 = vpop.f32.mrb[10].mxu1 }
 0x2bd   :  { %v276_v13 = vpack.c.bf16 %v272_v12, %v269_v10  ;;  %v599_v14 = vpop.f32.mrb[11].mxu1 }
 0x2bf   :  { %438 = vmatmul.mubr.bf16.vlgmr.msra.gmra.mrb[0].mxu0 %v276_v13 }
 0x392   :  { %v570_v15 = vpop.f32.mrb[0].mxu0 }
 0x393   :  { %v571_v16 = vpop.f32.mrb[1].mxu0 }
 0x394   :  { %v572_v17 = vadd.f32 %v571_v16, %v570_v15  ;;  %v573_v2 = vpop.f32.mrb[2].mxu0 }
 0x395   :  { %v574_v18 = vpop.f32.mrb[3].mxu0 }
 0x396   :  { %v459_v19 = vmul.f32 %v572_v17, %v572_v17  ;;  %v575_v20 = vadd.f32 %v574_v18, %v573_v2  ;;  %v449_v21 = vsel %vm448_vm4, %v572_v17, 0.0 }
 0x398   :  { %v450_v22 = vsel %vm448_vm4, %v575_v20, 0.0  ;;  %v460_v23 = vmul.f32 %v575_v20, %v575_v20  ;;  %v461_v25 = vsel %vm448_vm4, %v459_v19, 0.0 }
 0x399   :  { %v451_v24 = vadd.f32 %v450_v22, %v449_v21 }
 0x39a   :  { %v462_v26 = vsel %vm448_vm4, %v460_v23, 0.0 }
 0x39b   :  { %v452_v27 = vrot.slane %v451_v24, 4  ;;  %v463_v28 = vadd.f32 %v462_v26, %v461_v25 }
 0x39d   :  { %v453_v29 = vadd.f32 %v452_v27, %v451_v24  ;;  %v464_v30 = vrot.slane %v463_v28, 4 }
 0x39f   :  { %v454_v31 = vrot.slane %v453_v29, 2  ;;  %v465_v32 = vadd.f32 %v464_v30, %v463_v28 }
 0x3a1   :  { %v455_v33 = vadd.f32 %v454_v31, %v453_v29  ;;  %v466_v34 = vrot.slane %v465_v32, 2 }
 0x3a3   :  { %v456_v35 = vrot.slane %v455_v33, 1  ;;  %v467_v36 = vadd.f32 %v466_v34, %v465_v32 }
 0x3a5   :  { %v457_v37 = vadd.f32 %v456_v35, %v455_v33  ;;  %v468_v38 = vrot.slane %v467_v36, 1 }
 0x3a7   :  { %v458_v39 = vmul.f32 0.0625, %v457_v37  ;;  %v469_v40 = vadd.f32 %v468_v38, %v467_v36 }
 0x3a9   :  { %v470_v41 = vmul.f32 0.0625, %v469_v40  ;;  %v471_v42 = vmul.f32 %v458_v39, %v458_v39 }
 0x3ab   :  { %v472_v43 = vsub.f32 %v470_v41, %v471_v42 }
 0x3ad   :  { %v473_v44 = vadd.f32 1e-05, %v472_v43 }
 0x3af   :  { %628 = vrsqrt.f32 %v473_v44 }
 0x3b9   :  { %v629_v46 = vpop.eup %628 }
 0x3ba   :  { %v475_v47 = vmul.f32 %v629_v46, %v446_v45 }
 0x3bc   :  { %v482_v49 = vrot.slane %v475_v47, %v781_v56  ;;  %v476_v50 = vmul.f32 %v475_v47, %v458_v39 }
 0x3be   :  { %v485_v51 = vmul.f32 %v575_v20, %v482_v49  ;;  %v477_v52 = vsub.f32 %v447_v48, %v476_v50  ;;  %v484_v53 = vmul.f32 %v572_v17, %v482_v49 }
 0x3c0   :  { %v490_v54 = vrot.slane %v477_v52, %v781_v56 }
 0x3c2   :  { %v492_v55 = vadd.f32 %v490_v54, %v484_v53  ;;  %v493_v57 = vadd.f32 %v490_v54, %v485_v51 }
 0x3c4   :  { %v494_v58 = vmax.f32 %v492_v55, 0.0  ;;  %v495_v59 = vmax.f32 %v493_v57, 0.0 }
 0x3c6   :  { %500 = vrot.lane.b32.xlu0 %v494_v58, %s656_s27 }
 0x3ca   :  { %502 = vrot.lane.b32.xlu0 %v495_v59, %s656_s27 }
 0x438   :  { %v501_v60 = vpop.permute.xlu0 %500 }
 0x439   :  { %507 = vst.msk [vmem:[#allocation2] sm:$0xff] %vm506_vm5, %v501_v60 }
 0x43c   :  { %v503_v61 = vpop.permute.xlu0 %502 }
 0x43d   :  { %508 = vst.msk [vmem:[#allocation2 + $0x8] sm:$0xff] %vm506_vm5, %v503_v61 }
 0x43e   :  { %641 = shalt.err (!%p638_p4)
}
 0x43f   :  { %s642_s10 = scalar_lea.hbm %s825_s9, 256 }
 0x440   :  { %p643_p5 = scmp.ne.s32.totalorder %s825_s9, %s642_s10  ;;  %p646_p6 = scmp.lt.u32.totalorder %s642_s10, %s825_s9 }
 0x442   :  { %p648_p7 = pnand %p646_p6, %p643_p5 }
 0x444   :  { %651 = shalt.err (!%p648_p7)
}
 0x445   :  { %s658_s15 = smov 128  }
 0x446   :  { %520 = dma.vmem_to_hbm [thread:$0]  %s515_s28, 256, %s825_s9, [#allocation3], %s658_s15, %s658_s15, %s656_s27  }
 0x447   :  { %652 = dma.done.wait [#allocation3], 256  }
 0x448   :  { %653 = vsyncadd [#allocation3], 4294967040 }
 0x449   :  { %524 = vsyncpa [#allocation3], 1 }

</bundles_post_ra>
